<compile_context>
chip_gen: v5e
topology: v5e:2x2
jax: 0.10.0
libtpu: 0.0.40
codegen_flags: <defaults>
</compile_context>

<pallas_src>
import jax
import jax.numpy as jnp
from jax.experimental import pallas as pl
from jax.experimental.pallas import tpu as pltpu


def _fusion_kernel(inv3_ref, enc_ref, out_ref):
    # inv3_ref: (b_tile, C_inv, 1)        -- per-batch InceptionV3 feature vector
    # enc_ref : (b_tile, C_enc, HW_tile)  -- encoder tile (NCHW, spatial flat)
    # out_ref : (b_tile, C_enc + C_inv, HW_tile)
    b_t, c_enc, hw = enc_ref.shape
    c_inv = inv3_ref.shape[1]
    dt = out_ref.dtype

    # Direct sub-slice stores: plain copy + lane-broadcast, no concat temporary.
    out_ref[:, :c_enc, :] = enc_ref[...].astype(dt)
    out_ref[:, c_enc:, :] = jnp.broadcast_to(
        inv3_ref[...], (b_t, c_inv, hw)
    ).astype(dt)


# Total budget for double-buffered input+output blocks (bytes). Conservative
# enough for v7x's 64 MiB physical VMEM; still >= the 512+ lane sweet spot on
# v5e/v6e for realistic channel counts.
_DATA_BUDGET = 28 << 20


def _padded_block_bytes(shape, dtype):
    """VMEM footprint of one buffer of `shape`: last dim padded to 128 lanes,
    second-last to 8 sublanes (conservative for 32-bit; headroom covers packing)."""
    *lead, s, l = shape
    s_p = -(-s // 8) * 8
    l_p = -(-l // 128) * 128
    n = 1
    for d in lead:
        n *= d
    return n * s_p * l_p * jnp.dtype(dtype).itemsize


def _pick_hw_tile(hw, max_lanes):
    """Largest multiple of 128 that divides hw and fits max_lanes; else full extent."""
    if hw % 128 != 0:
        return hw  # full extent is always a legal block dim
    cap = max(128, min(hw, max_lanes))
    best = 128
    t = 128
    while t <= cap:
        if hw % t == 0:
            best = t
        t += 128
    return best


def feature_extraction(inv3_img, enc_img):
    """inv3_img: (B, C_inv); enc_img: (B, C_enc, H, W) NCHW.
    Returns (B, C_enc + C_inv, H, W), matching the torch module."""
    b, c_enc, h, w = enc_img.shape
    c_inv = inv3_img.shape[1]
    hw = h * w
    c_tot = c_enc + c_inv
    # Match torch's type promotion in cat.
    # TODO(synk): if the consumer tolerates bf16 end-to-end, skipping promotion
    # to f32 halves output bytes (the dominant HBM term).
    out_dtype = jnp.promote_types(enc_img.dtype, inv3_img.dtype)

    enc_flat = enc_img.reshape(b, c_enc, hw)   # free reshape (adjacent-dim merge)
    inv3 = inv3_img.reshape(b, c_inv, 1)       # channels -> sublanes, single lane

    isz_enc = jnp.dtype(enc_img.dtype).itemsize
    isz_inv = jnp.dtype(inv3_img.dtype).itemsize
    isz_out = jnp.dtype(out_dtype).itemsize

    # --- spatial tile from VMEM budget (double-buffered enc + out per lane) ---
    bytes_per_lane = 2 * (c_enc * isz_enc + c_tot * isz_out)
    max_lanes = max(128, (_DATA_BUDGET // max(bytes_per_lane, 1)) // 128 * 128)
    hw_tile = _pick_hw_tile(hw, max_lanes)
    n_hw = hw // hw_tile

    # --- batch fusion when the full spatial extent fits in one small tile ---
    b_tile = 1
    if n_hw == 1 and b > 1:
        per_batch = 2 * (c_enc * hw_tile * isz_enc + c_tot * hw_tile * isz_out)
        max_b = max(1, _DATA_BUDGET // max(per_batch, 1))
        # Keep >= 2 grid steps so both v7x TensorCores get work.
        max_b = min(max_b, max(1, b // 2))
        for k in range(min(max_b, b), 0, -1):
            if b % k == 0:
                b_tile = k
                break
    n_b = b // b_tile

    # --- VMEM limit derived from the actual (padded, double-buffered) footprint ---
    enc_blk = _padded_block_bytes((b_tile, c_enc, hw_tile), enc_img.dtype)
    inv_blk = _padded_block_bytes((b_tile, c_inv, 1), inv3_img.dtype)
    out_blk = _padded_block_bytes((b_tile, c_tot, hw_tile), out_dtype)
    footprint = 2 * (enc_blk + inv_blk + out_blk)
    vmem_limit = int(min(max(footprint + (2 << 20), 4 << 20), 64 << 20))

    bytes_accessed = (
        enc_img.size * isz_enc
        + inv3_img.size * isz_inv
        + b * c_tot * hw * isz_out
    )

    out_flat = pl.pallas_call(
        _fusion_kernel,
        out_shape=jax.ShapeDtypeStruct((b, c_tot, hw), out_dtype),
        grid=(n_b, n_hw),
        in_specs=[
            # inv3 index depends only on the batch axis -> fetched once per
            # batch block, not re-DMA'd across spatial steps.
            pl.BlockSpec((b_tile, c_inv, 1), lambda i, j: (i, 0, 0)),
            pl.BlockSpec((b_tile, c_enc, hw_tile), lambda i, j: (i, 0, j)),
        ],
        out_specs=pl.BlockSpec((b_tile, c_tot, hw_tile), lambda i, j: (i, 0, j)),
        compiler_params=pltpu.CompilerParams(
            dimension_semantics=("parallel", "parallel"),
            vmem_limit_bytes=vmem_limit,
        ),
        cost_estimate=pl.CostEstimate(
            flops=0, transcendentals=0, bytes_accessed=bytes_accessed
        ),
    )(inv3, enc_flat)

    return out_flat.reshape(b, c_tot, h, w)


def feature_extraction_ref(inv3_img, enc_img):
    """Pure-JAX reference with identical semantics (for verification)."""
    b, _, h, w = enc_img.shape
    c_inv = inv3_img.shape[1]
    y = jnp.broadcast_to(inv3_img[:, :, None, None], (b, c_inv, h, w))
    return jnp.concatenate([enc_img, y], axis=1)


if __name__ == "__main__":
    key = jax.random.PRNGKey(0)
    k1, k2 = jax.random.split(key)

    B, C_ENC, H, W = 2, 4, 16, 16    # enc_img: encoder feature map (NCHW)
    C_INV = 8                        # inv3_img: (B, C_INV) feature vector

    inv3_img = jax.random.normal(k1, (B, C_INV), dtype=jnp.float32)
    enc_img = jax.random.normal(k2, (B, C_ENC, H, W), dtype=jnp.float32)

    out = feature_extraction(inv3_img, enc_img)
    out = jax.block_until_ready(out)

    ref = feature_extraction_ref(inv3_img, enc_img)
    assert out.shape == (B, C_ENC + C_INV, H, W), out.shape
    assert out.dtype == ref.dtype
    assert jnp.allclose(out, ref), "mismatch vs reference"

    print("KERNEL_OK")
</pallas_src>

<mosaic_0001>
module attributes {stable_mosaic.version = 11 : i64} {
  func.func @_fusion_kernel(%arg0: i32, %arg1: i32, %arg2: memref<1x8x1xf32, #tpu.memory_space<vmem>>, %arg3: memref<1x4x256xf32, #tpu.memory_space<vmem>>, %arg4: memref<1x12x256xf32, #tpu.memory_space<vmem>>) attributes {dimension_semantics = [#tpu.dimension_semantics<parallel>, #tpu.dimension_semantics<parallel>], iteration_bounds = array<i64: 2, 1>, scalar_prefetch = 0 : i64, scratch_operands = 0 : i64, tpu.core_type = #tpu.core_type<tc>, window_params = [{transform_indices = @transform_0, window_bounds = array<i64: 1, 8, 1>}, {transform_indices = @transform_1, window_bounds = array<i64: 1, 4, 256>}, {transform_indices = @transform_2, window_bounds = array<i64: 1, 12, 256>}]} {
    %c0 = arith.constant 0 : index
    %c0_0 = arith.constant 0 : index
    %c0_1 = arith.constant 0 : index
    %0 = vector.load %arg3[%c0, %c0_0, %c0_1] : memref<1x4x256xf32, #tpu.memory_space<vmem>>, vector<1x4x256xf32>
    %c0_2 = arith.constant 0 : index
    %c0_3 = arith.constant 0 : index
    %c0_4 = arith.constant 0 : index
    %1 = vector.load %arg4[%c0_2, %c0_3, %c0_4] : memref<1x12x256xf32, #tpu.memory_space<vmem>>, vector<1x4x256xf32>
    tpu.vector_store %arg4[%c0_2, %c0_3, %c0_4], %0 {strides = array<i32>} : memref<1x12x256xf32, #tpu.memory_space<vmem>>, vector<1x4x256xf32>,
    %c0_5 = arith.constant 0 : index
    %c0_6 = arith.constant 0 : index
    %c0_7 = arith.constant 0 : index
    %2 = vector.load %arg2[%c0_5, %c0_6, %c0_7] : memref<1x8x1xf32, #tpu.memory_space<vmem>>, vector<1x8x1xf32>
    %3 = vector.shape_cast %2 : vector<1x8x1xf32> to vector<1x8x1xf32>
    %4 = vector.broadcast %3 : vector<1x8x1xf32> to vector<1x8x256xf32>
    %c0_8 = arith.constant 0 : index
    %c4 = arith.constant 4 : index
    %c0_9 = arith.constant 0 : index
    %5 = vector.load %arg4[%c0_8, %c4, %c0_9] : memref<1x12x256xf32, #tpu.memory_space<vmem>>, vector<1x8x256xf32>
    tpu.vector_store %arg4[%c0_8, %c4, %c0_9], %4 {strides = array<i32>} : memref<1x12x256xf32, #tpu.memory_space<vmem>>, vector<1x8x256xf32>,
    return
  }
  func.func @transform_0(%arg0: i32, %arg1: i32) -> (i32, i32, i32) {
    %c0_i32 = arith.constant 0 : i32
    %c0_i32_0 = arith.constant 0 : i32
    %c0_i32_1 = arith.constant 0 : i32
    return %arg0, %c0_i32, %c0_i32_0 : i32, i32, i32
  }
  func.func @transform_1(%arg0: i32, %arg1: i32) -> (i32, i32, i32) {
    %c0_i32 = arith.constant 0 : i32
    %c0_i32_0 = arith.constant 0 : i32
    return %arg0, %c0_i32, %arg1 : i32, i32, i32
  }
  func.func @transform_2(%arg0: i32, %arg1: i32) -> (i32, i32, i32) {
    %c0_i32 = arith.constant 0 : i32
    %c0_i32_0 = arith.constant 0 : i32
    return %arg0, %c0_i32, %arg1 : i32, i32, i32
  }
}

</mosaic_0001>

<bundles_post_ra>
// kernel: tpu_custom_call.1
= control target key start
LH: loop header
LB: loop body
LE: loop exit
PB: predicated region body
PF: predicated region fallthrough
CT: control target
= control target key end

     0   :  { %s399_s9 = smov 0   ;;  %s401_s10 = smov 0   ;;  %s435_s0 = inlined_call_operand.vmem [shape: f32[2,8,1], index: 0, kind: input, shape index: {}]   ;;  %s436_s1 = inlined_call_operand.vmem [shape: f32[2,4,256], index: 1, kind: input, shape index: {}]   ;;  %s437_s2 = inlined_call_operand.vmem [shape: f32[2,12,256], index: 2, kind: output, shape index: {}]  }
   0x1   :  { %s403_s11 = smov 0  }
   0x2 LB: > { %s24_s12 = sadd.s32 1, %s377_s10  ;;  %p323_p0 = scmp.ge.s32.totalorder %s381_s11, 1  ;;  %s381_s11 = sphi %s403_s11, %s12_s11   ;;  %s377_s10 = sphi %s401_s10, %s439_s10   ;;  %s373_s9 = sphi %s399_s9, %s438_s9  }
   0x3   : > { %p26_p1 = scmp.ge.s32.totalorder %s24_s12, 2  ;;  %p142_p2 = scmp.lt.s32.totalorder %s381_s11, 3 }
   0x5   : > { %s441_s12 = smov (%p26_p1, %s24_s12), 0  ;;  %p143_p3 = pnand %p323_p0, %p142_p2 }
   0x6   : > { %p176_p4 = scmp.lt.s32.totalorder (!%p143_p3), %s373_s9, 1 }
   0x7   : > { %146 = sbr.rel (%p143_p3) target bundleno = 138 (0x8a), region = 28 }
   0xc   : > { %v383_v0 = vmov 0   ;;  %s443_s9 = smov (!%p176_p4, %s373_s9), 1 }
   0xd   : > { %358 = vset.pattern.permute.xlu0 %v383_v0  ;;  %s324_s13 = sshll.u32 %s443_s9, 3  ;;  %s332_s20 = sshll.u32 %s443_s9, 5 }
   0xe   : > { %s179_s16 = scalar_lea.vmem %s435_s0, %s324_s13  ;;  %s188_s19 = scalar_lea.vmem %s436_s1, %s324_s13 }
   0xf   : > { %v200_v1 = vld [vmem:[%s188_s19] sm:$0xff]  ;;  %s198_s23 = scalar_lea.vmem %s437_s2, %s332_s20 }
  0x10   : > { %v209_v2 = vld [vmem:[%s179_s16] sm:$0xff]  ;;  %202 = vst [vmem:[#allocation1] ss:$2 sm:$0xff] %v200_v1 }
  0x11   : > { %212 = vperm.xlu0 %358, %v209_v2  }
  0x17   : > { %v203_v3 = vld.sshfl [vmem:[#allocation1] sm:$0xff pattern:$0x75316420]  ;;  %v204_v4 = vld.sshfl [vmem:[#allocation1 + $0x8] sm:$0xff pattern:$0x75316420] }
  0x18   : > { %207 = vst [vmem:[%s198_s23] sm:$0xf] %v203_v3 }
  0x19   : > { %208 = vst [vmem:[%s198_s23 + $0x8] sm:$0xf] %v204_v4 }
  0x83   : > { %v213_v5 = vpop.permute.xlu0 %212 }
  0x84   : > { %v214_v6 = vrot.slane %v213_v5, 4 }
  0x86   : > { %216 = vst [vmem:[%s198_s23] sm:$0xf0] %v214_v6 }
  0x87   : > { %217 = vst [vmem:[%s198_s23 + $0x8] sm:$0xf0] %v214_v6 }
  0x88   : > { %218 = vst [vmem:[%s198_s23 + $0x10] sm:$0xf] %v214_v6 }
  0x89   : > { %219 = vst [vmem:[%s198_s23 + $0x18] sm:$0xf] %v214_v6 }
  0x8a PF: > { %s12_s11 = sadd.s32 1, %s381_s11   ;;  %s438_s9 = smov %s377_s10 }
  0x8b   : > { %p9_p5 = scmp.ge.s32.totalorder %s12_s11, 4   ;;  %s439_s10 = smov %s441_s12 }
  0x8d   :  { %11 = sbr.rel (!%p9_p5) target bundleno = 2 (0x2), region = 61 }

</bundles_post_ra>
